<compile_context>
chip_gen: v6e
topology: v6e:2x2x1
jax: 0.10.0
libtpu: 0.0.40
codegen_flags: <defaults>
</compile_context>

<pallas_src>
import functools

import jax
import jax.numpy as jnp
from jax import lax
from jax.experimental import pallas as pl
from jax.experimental.pallas import tpu as pltpu

# ------------------------- config (small, deterministic) -------------------------
N_NODES   = 16
FEAT_DIM  = 8
HIDDEN    = 8
N_HEADS   = 2
N_CLASSES = 4
N_CONVS   = 64          # diffTrackProcesser hardcodes 64 baseTrackConv layers
FEAT_W    = 0.5         # config.feat_weight (static scalar, baked into kernel)

H_ALL = HIDDEN * N_HEADS            # hidden after input_layer                = 16
CH    = N_CLASSES * H_ALL           # flattened (class, hidden) feature dim   = 64
CH2   = 2 * CH                      # both tracks lane-packed                 = 128
NN2   = 2 * N_NODES                 # augmented block-matrix dimension        = 32

LOG2_CONVS = N_CONVS.bit_length() - 1    # 6
assert (1 << LOG2_CONVS) == N_CONVS, "log-doubling assumes N_CONVS is a power of 2"
# gcn_norm gives spectral radius(A_hat) <= 1, so rho(M) <= FEAT_W; the bf16 doubling
# chain is well-conditioned only for 0 <= FEAT_W <= 1.
assert 0.0 <= FEAT_W <= 1.0


# ------------------------------- fused Pallas kernel -------------------------------
def _fused_kernel(xa_ref, a_ref, t0_ref, const_ref, gwb_ref, out_ref):
    """input_layer + 64x baseTrackConv (both tracks) + get_message + merge, fused."""
    f32, bf16 = jnp.float32, jnp.bfloat16

    # ---- unpack packed operands (static slices: cheap vreg selects / views) ----
    xa       = xa_ref[...]                                            # (N, FEAT+C)
    x        = xa[:, :FEAT_DIM]                                       # (N, FEAT)
    attn     = xa[:, FEAT_DIM:]                                       # (N, C)
    w_in_rep = const_ref[0:FEAT_DIM, :]                               # (FEAT, CH2)
    r_mat    = const_ref[FEAT_DIM:FEAT_DIM + N_CLASSES, :]            # (C, CH2)
    b_in_rep = const_ref[FEAT_DIM + N_CLASSES:FEAT_DIM + N_CLASSES + 1, :]  # (1, CH2)
    gw       = gwb_ref[0:CH2, :]                                      # (CH2, HIDDEN)
    bm2      = gwb_ref[CH2:CH2 + 1, :]                                # (1, HIDDEN)

    # ---- input_layer at full 128-lane width: Dropout(no-op) -> Linear -> ReLU ----
    init_full = jnp.maximum(
        jnp.dot(x.astype(bf16), w_in_rep.astype(bf16),
                preferred_element_type=f32) + b_in_rep, 0.0)          # (N, CH2)
    c_vec = (1.0 - FEAT_W) * init_full                                # recurrence constant

    # ---- 64x baseTrackConv:  t <- fw*A@(A@t) + (1-fw)*x0  ==  t <- M t + c ----
    # a_ref holds sqrt(fw)*A_hat embedded in a (2N,2N) zero matrix, so a@a gives
    # M = fw*A_hat^2 directly in the top-left block.  Augmented block matrix
    #   B = [[M, I], [0, I]],   B^(2^k) = [[M^(2^k), S_(2^k)], [0, I]]
    # -> 6 dependent 32x32 squarings give both operands of the closed form
    #   t_64 = M^64 t_0 + S_64 c.
    row = lax.broadcasted_iota(jnp.int32, (NN2, NN2), 0)
    col = lax.broadcasted_iota(jnp.int32, (NN2, NN2), 1)
    k_const = jnp.where((col >= N_NODES) &
                        ((col - row == N_NODES) | (col == row)),
                        1.0, 0.0).astype(f32)                         # [[0, I], [0, I]]
    a_bf = a_ref[...].astype(bf16)
    b = jnp.dot(a_bf, a_bf, preferred_element_type=f32) + k_const     # B (32, 32)
    for _ in range(LOG2_CONVS):                                       # static unroll (6)
        b16 = b.astype(bf16)
        b = jnp.dot(b16, b16, preferred_element_type=f32)             # B^2, ..., B^64

    stacked = jnp.concatenate([t0_ref[...], c_vec], axis=0)           # (2N, CH2)
    t = jnp.dot(b[:N_NODES, :].astype(bf16), stacked.astype(bf16),
                preferred_element_type=f32)                           # (N, CH2)

    # ---- get_message + extra_embeding + merge_group*0.5 + 0.5*r0 (all folded) ----
    # attn_exp[n, col] = attn[n, class(col)] via one-hot expansion (independent of
    # the squaring chain -> overlaps on the MXU).
    attn_exp = jnp.dot(attn.astype(bf16), r_mat.astype(bf16),
                       preferred_element_type=f32)                    # (N, CH2)
    p = t * attn_exp
    out_ref[...] = jnp.dot(p.astype(bf16), gw.astype(bf16),
                           preferred_element_type=f32) + bm2          # (N, HIDDEN)


_vmem = functools.partial(pl.BlockSpec, memory_space=pltpu.MemorySpace.VMEM)

_fused_call = pl.pallas_call(
    _fused_kernel,
    out_shape=jax.ShapeDtypeStruct((N_NODES, HIDDEN), jnp.float32),
    in_specs=[_vmem()] * 5,
    out_specs=_vmem(),
)


# ------------------------------------ glue -----------------------------------------
def build_gcn_adj(edge_index, num_nodes):
    """Dense gcn_norm: D^{-1/2} (A + I) D^{-1/2} (PyG gcn_norm, add_self_loops=True)."""
    src, dst = edge_index
    a = jnp.zeros((num_nodes, num_nodes), jnp.float32)
    a = a.at[dst, src].add(1.0)                      # A[target, source]
    a = a + jnp.eye(num_nodes, dtype=jnp.float32)    # self loops
    deg = jnp.sum(a, axis=1)
    dinv = jnp.where(deg > 0, lax.rsqrt(deg), 0.0)
    return dinv[:, None] * a * dinv[None, :]


def prepare_params(params):
    """One-time host-side folding of the epilogue linears into two small slabs."""
    w_in, b_in, w_ex, b_ex, w_m, b_m = params
    cols = jnp.arange(CH2)
    # class-expansion one-hot R: (C, CH2); attn @ R gives per-column attention weight
    cls = (cols // H_ALL) % N_CLASSES
    r_mat = (cls[None, :] == jnp.arange(N_CLASSES)[:, None]).astype(jnp.float32)
    # extra_embeding as a (CH2, 2*HIDDEN) track-block-diagonal matrix of head weights
    trk  = cols // CH
    head = (cols % H_ALL) // HIDDEN
    hid  = cols % HIDDEN
    g_mat = jnp.zeros((CH2, 2 * HIDDEN), jnp.float32)
    g_mat = g_mat.at[cols, trk * HIDDEN + hid].set(w_ex[0, head])
    # merge_group * 0.5 + 0.5*r0 residual; extra_embeding bias folded into bm2
    eye = jnp.eye(HIDDEN, dtype=jnp.float32)
    wm2 = jnp.concatenate(
        [0.5 * (w_m[0:HIDDEN] + w_m[2 * HIDDEN:3 * HIDDEN]) + 0.5 * eye,
         0.5 * (w_m[HIDDEN:2 * HIDDEN] - w_m[2 * HIDDEN:3 * HIDDEN])], axis=0)
    bm2 = 0.5 * b_m + b_ex[0, 0] * jnp.sum(wm2, axis=0, keepdims=True)
    # --- fold the two epilogue matmuls into one: GW = g_mat @ wm2 ---
    gw  = g_mat @ wm2                                   # (CH2, HIDDEN)
    gwb = jnp.concatenate([gw, bm2], axis=0)            # (CH2 + 1, HIDDEN)
    # --- lane-wide constant slab: [w_in tiled ; r_mat ; b_in tiled ; pad] ---
    w_in_rep = jnp.tile(w_in, (1, 2 * N_CLASSES))       # (FEAT, CH2)
    b_in_rep = jnp.tile(b_in, (1, 2 * N_CLASSES))       # (1, CH2)
    rows = FEAT_DIM + N_CLASSES + 1
    slab_rows = -(-rows // 8) * 8
    const_slab = jnp.zeros((slab_rows, CH2), jnp.float32)
    const_slab = const_slab.at[0:FEAT_DIM].set(w_in_rep)
    const_slab = const_slab.at[FEAT_DIM:FEAT_DIM + N_CLASSES].set(r_mat)
    const_slab = const_slab.at[FEAT_DIM + N_CLASSES].set(b_in_rep[0])
    return (const_slab, gwb)


@jax.jit
def diff_track_processer_forward(track_list, attn, x, edge_index, prep, pre_emb=None):
    # pre_emb is accepted but unused, matching the PyTorch forward.
    const_slab, gwb = prep
    a_hat = build_gcn_adj(edge_index, N_NODES)
    # sqrt(fw)*A_hat embedded in the top-left of a (2N,2N) zero matrix, so the
    # kernel's a@a directly produces M = fw*A_hat^2 in the top-left block.
    a_aug = jnp.zeros((NN2, NN2), jnp.float32)
    a_aug = a_aug.at[:N_NODES, :N_NODES].set((FEAT_W ** 0.5) * a_hat)
    # 'c n h -> n (c h)' for both tracks, lane-packed side by side into (N, 128)
    t0 = jnp.transpose(jnp.stack(track_list, axis=0), (2, 0, 1, 3)).reshape(N_NODES, CH2)
    xa = jnp.concatenate([x, attn], axis=1)              # (N, FEAT + C)
    return _fused_call(xa, a_aug, t0, const_slab, gwb)


def reference_forward(track_list, attn, x, edge_index, params):
    """Pure-JAX reference mirroring the PyTorch semantics (for validation)."""
    w_in, b_in, w_ex, b_ex, w_m, b_m = params
    a_hat = build_gcn_adj(edge_index, N_NODES)
    init = jax.nn.relu(x @ w_in + b_in)
    init_rep = jnp.tile(init, (1, N_CLASSES))
    res = []
    for i in range(2):
        t = jnp.transpose(track_list[i], (1, 0, 2)).reshape(N_NODES, CH)
        for _ in range(N_CONVS):
            t = FEAT_W * (a_hat @ (a_hat @ t)) + (1.0 - FEAT_W) * init_rep
        t3 = t.reshape(N_NODES, N_CLASSES, H_ALL)
        weighted = jnp.sum(attn[:, :, None] * t3, axis=1)               # (N, H_ALL)
        wr = weighted.reshape(N_NODES, N_HEADS, HIDDEN)
        r = jnp.einsum('neh,e->nh', wr, w_ex[0]) + b_ex[0, 0]
        res.append(r)
    m = jnp.concatenate([res[0], res[1], res[0] - res[1]], axis=-1)
    return 0.5 * (m @ w_m + b_m) + 0.5 * res[0]


# ------------------------------------ main ------------------------------------------
if __name__ == "__main__":
    key = jax.random.PRNGKey(0)
    keys = jax.random.split(key, 10)

    # deterministic synthetic parameters (shapes from the module's __init__)
    w_in = 0.1 * jax.random.normal(keys[0], (FEAT_DIM, H_ALL), jnp.float32)     # Linear(feat, hid*heads).T
    b_in = 0.1 * jax.random.normal(keys[1], (1, H_ALL), jnp.float32)
    w_ex = 0.5 * jax.random.normal(keys[2], (1, N_HEADS), jnp.float32)          # Linear(n_heads, 1)
    b_ex = 0.1 * jax.random.normal(keys[3], (1, 1), jnp.float32)
    w_m  = 0.1 * jax.random.normal(keys[4], (3 * HIDDEN, HIDDEN), jnp.float32)  # Linear(3*hid, hid).T
    b_m  = 0.1 * jax.random.normal(keys[5], (1, HIDDEN), jnp.float32)
    params = (w_in, b_in, w_ex, b_ex, w_m, b_m)
    prep = prepare_params(params)                 # one-time host-side weight folding

    # deterministic synthetic inputs
    x = jax.random.normal(keys[6], (N_NODES, FEAT_DIM), jnp.float32)
    track_list = [
        jax.random.normal(keys[7], (N_CLASSES, N_NODES, H_ALL), jnp.float32),
        jax.random.normal(keys[8], (N_CLASSES, N_NODES, H_ALL), jnp.float32),
    ]
    attn = jax.nn.softmax(jax.random.normal(keys[9], (N_NODES, N_CLASSES), jnp.float32), axis=-1)
    # undirected ring graph, edge_index (2, 2*N)
    idx = jnp.arange(N_NODES, dtype=jnp.int32)
    nxt = (idx + 1) % N_NODES
    edge_index = jnp.stack([jnp.concatenate([idx, nxt]),
                            jnp.concatenate([nxt, idx])], axis=0)

    # TODO(synk): dropout layers are modeled as inference-mode identities.
    out = diff_track_processer_forward(track_list, attn, x, edge_index, prep)
    out = jax.block_until_ready(out)

    ref = reference_forward(track_list, attn, x, edge_index, params)
    assert out.shape == (N_NODES, HIDDEN)
    assert bool(jnp.all(jnp.isfinite(out)))
    assert bool(jnp.allclose(out, ref, rtol=1e-2, atol=1e-2)), \
        f"max abs diff = {float(jnp.max(jnp.abs(out - ref)))}"

    print("KERNEL_OK")
</pallas_src>

<mosaic_0001>
module attributes {stable_mosaic.version = 11 : i64} {
  func.func private @main(%arg0: i32) attributes {dimension_semantics = [#tpu.dimension_semantics<core_parallel>], iteration_bounds = array<i64: 2>, tpu.core_type = #tpu.core_type<sc_scalar_subcore>, window_params = []} {
    return
  }
}

module attributes {stable_mosaic.version = 11 : i64} {
  func.func private @main(%arg0: i32) attributes {dimension_semantics = [#tpu.dimension_semantics<core_parallel>], iteration_bounds = array<i64: 2>, tpu.core_type = #tpu.core_type<sc_scalar_subcore>, window_params = []} {
    return
  }
}

module attributes {stable_mosaic.version = 11 : i64} {
  func.func @_fused_kernel(%arg0: memref<16x12xf32, #tpu.memory_space<vmem>>, %arg1: memref<32x32xf32, #tpu.memory_space<vmem>>, %arg2: memref<16x128xf32, #tpu.memory_space<vmem>>, %arg3: memref<16x128xf32, #tpu.memory_space<vmem>>, %arg4: memref<129x8xf32, #tpu.memory_space<vmem>>, %arg5: memref<16x8xf32, #tpu.memory_space<vmem>>) attributes {dimension_semantics = [], scalar_prefetch = 0 : i64, scratch_operands = 0 : i64, tpu.core_type = #tpu.core_type<tc>} {
    %c0 = arith.constant 0 : index
    %c0_0 = arith.constant 0 : index
    %0 = vector.load %arg0[%c0, %c0_0] : memref<16x12xf32, #tpu.memory_space<vmem>>, vector<16x12xf32>
    %1 = vector.extract_strided_slice %0 {offsets = [0, 0], sizes = [16, 8], strides = [1, 1]} : vector<16x12xf32> to vector<16x8xf32>
    %2 = vector.extract_strided_slice %0 {offsets = [0, 8], sizes = [16, 4], strides = [1, 1]} : vector<16x12xf32> to vector<16x4xf32>
    %c0_1 = arith.constant 0 : index
    %c0_2 = arith.constant 0 : index
    %3 = vector.load %arg3[%c0_1, %c0_2] : memref<16x128xf32, #tpu.memory_space<vmem>>, vector<8x128xf32>
    %c8 = arith.constant 8 : index
    %c0_3 = arith.constant 0 : index
    %4 = vector.load %arg3[%c8, %c0_3] : memref<16x128xf32, #tpu.memory_space<vmem>>, vector<4x128xf32>
    %c12 = arith.constant 12 : index
    %c0_4 = arith.constant 0 : index
    %5 = vector.load %arg3[%c12, %c0_4] : memref<16x128xf32, #tpu.memory_space<vmem>>, vector<1x128xf32>
    %c0_5 = arith.constant 0 : index
    %c0_6 = arith.constant 0 : index
    %6 = vector.load %arg4[%c0_5, %c0_6] : memref<129x8xf32, #tpu.memory_space<vmem>>, vector<128x8xf32>
    %c128 = arith.constant 128 : index
    %c0_7 = arith.constant 0 : index
    %7 = vector.load %arg4[%c128, %c0_7] : memref<129x8xf32, #tpu.memory_space<vmem>>, vector<1x8xf32>
    %8 = arith.truncf %1 : vector<16x8xf32> to vector<16x8xbf16>
    %9 = arith.truncf %3 : vector<8x128xf32> to vector<8x128xbf16>
    %cst = arith.constant dense<0.000000e+00> : vector<16x128xf32>
    %10 = tpu.matmul %8, %9, %cst {dimension_numbers = #tpu.dot_dimension_numbers<[1], [0], [0], [1], [0, 0, 1, 1], [], []>} : vector<16x8xbf16>, vector<8x128xbf16>, vector<16x128xf32> -> vector<16x128xf32>
    %11 = vector.broadcast %5 : vector<1x128xf32> to vector<16x128xf32>
    %12 = arith.addf %10, %11 : vector<16x128xf32>
    %cst_8 = arith.constant 0.000000e+00 : f32
    %13 = vector.broadcast %cst_8 : f32 to vector<16x128xf32>
    %14 = arith.maximumf %12, %13 : vector<16x128xf32>
    %cst_9 = arith.constant 5.000000e-01 : f32
    %15 = vector.broadcast %cst_9 : f32 to vector<16x128xf32>
    %16 = arith.mulf %15, %14 : vector<16x128xf32>
    %17 = tpu.iota {dimensions = array<i32: 0>} : vector<32x32xi32>
    %18 = tpu.iota {dimensions = array<i32: 1>} : vector<32x32xi32>
    %c16_i32 = arith.constant 16 : i32
    %19 = vector.broadcast %c16_i32 : i32 to vector<32x32xi32>
    %20 = arith.cmpi sge, %18, %19 : vector<32x32xi32>
    %21 = arith.subi %18, %17 : vector<32x32xi32>
    %c16_i32_10 = arith.constant 16 : i32
    %22 = vector.broadcast %c16_i32_10 : i32 to vector<32x32xi32>
    %23 = arith.cmpi eq, %21, %22 : vector<32x32xi32>
    %24 = arith.cmpi eq, %18, %17 : vector<32x32xi32>
    %25 = arith.ori %23, %24 : vector<32x32xi1>
    %26 = arith.andi %20, %25 : vector<32x32xi1>
    %cst_11 = arith.constant 1.000000e+00 : f32
    %cst_12 = arith.constant 0.000000e+00 : f32
    %27 = vector.broadcast %cst_11 : f32 to vector<32x32xf32>
    %28 = vector.broadcast %cst_12 : f32 to vector<32x32xf32>
    %29 = arith.select %26, %27, %28 : vector<32x32xi1>, vector<32x32xf32>
    %c0_13 = arith.constant 0 : index
    %c0_14 = arith.constant 0 : index
    %30 = vector.load %arg1[%c0_13, %c0_14] : memref<32x32xf32, #tpu.memory_space<vmem>>, vector<32x32xf32>
    %31 = arith.truncf %30 : vector<32x32xf32> to vector<32x32xbf16>
    %cst_15 = arith.constant dense<0.000000e+00> : vector<32x32xf32>
    %32 = tpu.matmul %31, %31, %cst_15 {dimension_numbers = #tpu.dot_dimension_numbers<[1], [0], [0], [1], [0, 0, 1, 1], [], []>} : vector<32x32xbf16>, vector<32x32xbf16>, vector<32x32xf32> -> vector<32x32xf32>
    %33 = arith.addf %32, %29 : vector<32x32xf32>
    %34 = arith.truncf %33 : vector<32x32xf32> to vector<32x32xbf16>
    %cst_16 = arith.constant dense<0.000000e+00> : vector<32x32xf32>
    %35 = tpu.matmul %34, %34, %cst_16 {dimension_numbers = #tpu.dot_dimension_numbers<[1], [0], [0], [1], [0, 0, 1, 1], [], []>} : vector<32x32xbf16>, vector<32x32xbf16>, vector<32x32xf32> -> vector<32x32xf32>
    %36 = arith.truncf %35 : vector<32x32xf32> to vector<32x32xbf16>
    %cst_17 = arith.constant dense<0.000000e+00> : vector<32x32xf32>
    %37 = tpu.matmul %36, %36, %cst_17 {dimension_numbers = #tpu.dot_dimension_numbers<[1], [0], [0], [1], [0, 0, 1, 1], [], []>} : vector<32x32xbf16>, vector<32x32xbf16>, vector<32x32xf32> -> vector<32x32xf32>
    %38 = arith.truncf %37 : vector<32x32xf32> to vector<32x32xbf16>
    %cst_18 = arith.constant dense<0.000000e+00> : vector<32x32xf32>
    %39 = tpu.matmul %38, %38, %cst_18 {dimension_numbers = #tpu.dot_dimension_numbers<[1], [0], [0], [1], [0, 0, 1, 1], [], []>} : vector<32x32xbf16>, vector<32x32xbf16>, vector<32x32xf32> -> vector<32x32xf32>
    %40 = arith.truncf %39 : vector<32x32xf32> to vector<32x32xbf16>
    %cst_19 = arith.constant dense<0.000000e+00> : vector<32x32xf32>
    %41 = tpu.matmul %40, %40, %cst_19 {dimension_numbers = #tpu.dot_dimension_numbers<[1], [0], [0], [1], [0, 0, 1, 1], [], []>} : vector<32x32xbf16>, vector<32x32xbf16>, vector<32x32xf32> -> vector<32x32xf32>
    %42 = arith.truncf %41 : vector<32x32xf32> to vector<32x32xbf16>
    %cst_20 = arith.constant dense<0.000000e+00> : vector<32x32xf32>
    %43 = tpu.matmul %42, %42, %cst_20 {dimension_numbers = #tpu.dot_dimension_numbers<[1], [0], [0], [1], [0, 0, 1, 1], [], []>} : vector<32x32xbf16>, vector<32x32xbf16>, vector<32x32xf32> -> vector<32x32xf32>
    %44 = arith.truncf %43 : vector<32x32xf32> to vector<32x32xbf16>
    %cst_21 = arith.constant dense<0.000000e+00> : vector<32x32xf32>
    %45 = tpu.matmul %44, %44, %cst_21 {dimension_numbers = #tpu.dot_dimension_numbers<[1], [0], [0], [1], [0, 0, 1, 1], [], []>} : vector<32x32xbf16>, vector<32x32xbf16>, vector<32x32xf32> -> vector<32x32xf32>
    %c0_22 = arith.constant 0 : index
    %c0_23 = arith.constant 0 : index
    %46 = vector.load %arg2[%c0_22, %c0_23] : memref<16x128xf32, #tpu.memory_space<vmem>>, vector<16x128xf32>
    %47 = tpu.concatenate %46, %16 in 0 : vector<16x128xf32>, vector<16x128xf32> -> vector<32x128xf32>
    %48 = vector.extract_strided_slice %45 {offsets = [0, 0], sizes = [16, 32], strides = [1, 1]} : vector<32x32xf32> to vector<16x32xf32>
    %49 = arith.truncf %48 : vector<16x32xf32> to vector<16x32xbf16>
    %50 = arith.truncf %47 : vector<32x128xf32> to vector<32x128xbf16>
    %cst_24 = arith.constant dense<0.000000e+00> : vector<16x128xf32>
    %51 = tpu.matmul %49, %50, %cst_24 {dimension_numbers = #tpu.dot_dimension_numbers<[1], [0], [0], [1], [0, 0, 1, 1], [], []>} : vector<16x32xbf16>, vector<32x128xbf16>, vector<16x128xf32> -> vector<16x128xf32>
    %52 = arith.truncf %2 : vector<16x4xf32> to vector<16x4xbf16>
    %53 = arith.truncf %4 : vector<4x128xf32> to vector<4x128xbf16>
    %cst_25 = arith.constant dense<0.000000e+00> : vector<16x128xf32>
    %54 = tpu.matmul %52, %53, %cst_25 {dimension_numbers = #tpu.dot_dimension_numbers<[1], [0], [0], [1], [0, 0, 1, 1], [], []>} : vector<16x4xbf16>, vector<4x128xbf16>, vector<16x128xf32> -> vector<16x128xf32>
    %55 = arith.mulf %51, %54 : vector<16x128xf32>
    %56 = arith.truncf %55 : vector<16x128xf32> to vector<16x128xbf16>
    %57 = arith.truncf %6 : vector<128x8xf32> to vector<128x8xbf16>
    %cst_26 = arith.constant dense<0.000000e+00> : vector<16x8xf32>
    %58 = tpu.matmul %56, %57, %cst_26 {dimension_numbers = #tpu.dot_dimension_numbers<[1], [0], [0], [1], [0, 0, 1, 1], [], []>} : vector<16x128xbf16>, vector<128x8xbf16>, vector<16x8xf32> -> vector<16x8xf32>
    %59 = vector.broadcast %7 : vector<1x8xf32> to vector<16x8xf32>
    %60 = arith.addf %58, %59 : vector<16x8xf32>
    %c0_27 = arith.constant 0 : index
    %c0_28 = arith.constant 0 : index
    %61 = vector.load %arg5[%c0_27, %c0_28] : memref<16x8xf32, #tpu.memory_space<vmem>>, vector<16x8xf32>
    tpu.vector_store %arg5[%c0_27, %c0_28], %60 {strides = array<i32>} : memref<16x8xf32, #tpu.memory_space<vmem>>, vector<16x8xf32>,
    return
  }
}

</mosaic_0001>

<bundles_post_ra>
// kernel: diff_track_processer_forward.1
= control target key start
LH: loop header
LB: loop body
LE: loop exit
PB: predicated region body
PF: predicated region fallthrough
CT: control target
= control target key end

     0   :  { %v862_v0 = vmov 0.0   ;;  %vm53_vm0 = vcmask 1043456   ;;  %vm863_vm1 = vmmov 0   ;;  %vm1056_vm2 = vcmask 64512   ;;  %s864_s7 = smov 120   ;;  %s1050_s3 = inlined_call_operand.vmem [shape: f32[16,128], index: 3, kind: input, shape index: {}]   ;;  %s1051_s0 = inlined_call_operand.vmem [shape: f32[16,12], index: 0, kind: input, shape index: {}]   ;;  %s1052_s1 = inlined_call_operand.vmem [shape: f32[32,32], index: 1, kind: input, shape index: {}]   ;;  %s1053_s2 = inlined_call_operand.vmem [shape: f32[16,128], index: 2, kind: input, shape index: {}]   ;;  %s1054_s4 = inlined_call_operand.vmem [shape: f32[129,8], index: 4, kind: input, shape index: {}]   ;;  %s1055_s5 = inlined_call_operand.vmem [shape: f32[16,8], index: 5, kind: output, shape index: {}]  }
   0x1   :  { %763 = vmatprep.subr.bf16.mxu1 %v862_v0  ;;  %v23_v1 = vld [vmem:[%s1050_s3] sm:$0xff]  ;;  %765 = vmatprep.mubr.msk.bf16.mxu1 %vm863_vm1, %v862_v0  ;;  %v22_v3 = vld [vmem:[%s1051_s0 + $0x8] sm:$0xff]  ;;  %v136_v5 = vld [vmem:[%s1052_s1 + $0x10] sm:$0xff]  ;;  %vm140_vm3 = vcmask 261120   ;;  %v102_v13 = vlaneseq }
   0x2   :  { %v21_v2 = vld [vmem:[%s1051_s0] sm:$0xff]  ;;  %v44_v4 = vpack.c.bf16 %v23_v1, %v23_v1  ;;  %v137_v6 = vld [vmem:[%s1052_s1 + $0x18] sm:$0xff]  ;;  %v135_v9 = vld [vmem:[%s1052_s1 + $0x8] sm:$0xff] }
   0x3   :  { %v139_v7 = vpack.c.bf16 %v137_v6, %v136_v5  ;;  %v134_v8 = vld [vmem:[%s1052_s1] sm:$0xff]  ;;  %v919_v11 = vpack.c.bf16 %v22_v3, %v21_v2  ;;  %v103_v14 = vshrl.u32 %v102_v13, 7  ;;  %v108_v16 = vand.u32 127, %v102_v13  ;;  %v700_v21 = vld [vmem:[%s1050_s3 + $0xc] ss:$0 sm:$0xff]  ;;  %v41_v27 = vld [vmem:[%s1054_s4 + $0x78] sm:$0xff] }
   0x4   :  { %v55_v10 = vsel %vm53_vm0, %v44_v4, 0  ;;  %v138_v12 = vpack.c.bf16 %v135_v9, %v134_v8 }
   0x5   :  { %764 = vmatpush3.bf16.msra.mxu1 %v55_v10  ;;  %v105_v15 = vadd.s32 16, %v103_v14  ;;  %v106_v18 = vadd.s32 24, %v103_v14  ;;  %v104_v19 = vadd.s32 8, %v103_v14  ;;  %v110_v22 = vsub.s32 %v108_v16, %v103_v14  ;;  %587 = vrot.lane.b32.xlu0 %v919_v11, %s864_s7 }
   0x6   :  { %769 = vmatprep.subr.bf16.mxu1 %v139_v7  ;;  %vm109_vm6 = vcmp.ge.s32.totalorder %v108_v16, 16  ;;  %vm118_vm11 = vcmp.eq.s32.totalorder %v108_v16, %v103_v14 }
   0x7   :  { %v112_v17 = vsub.s32 %v108_v16, %v105_v15  ;;  %vm120_vm5 = vcmp.eq.s32.totalorder %v108_v16, %v105_v15  ;;  %v113_v20 = vsub.s32 %v108_v16, %v106_v18  ;;  %v111_v23 = vsub.s32 %v108_v16, %v104_v19 }
   0x8   :  { %766 = vmatmul.mubr.msk.bf16.vlgmr.msra.gmra.mxu1 %vm1056_vm2, %v919_v11  ;;  %vm121_vm9 = vcmp.eq.s32.totalorder %v108_v16, %v106_v18  ;;  %vm114_vm10 = vcmp.eq.s32.totalorder %v110_v22, 16  ;;  %vm119_vm14 = vcmp.eq.s32.totalorder %v108_v16, %v104_v19  ;;  %v24_v11 = vld [vmem:[%s1050_s3 + $0x8] sm:$0xf] }
   0x9   :  { %770 = vmatpush3.bf16.msra.mxu1 %v139_v7  ;;  %773 = vmatprep.mubr.msk.bf16.mxu1 %vm140_vm3, %v138_v12  ;;  %vm116_vm4 = vcmp.eq.s32.totalorder %v112_v17, 16  ;;  %vm117_vm8 = vcmp.eq.s32.totalorder %v113_v20, 16  ;;  %vm115_vm13 = vcmp.eq.s32.totalorder %v111_v23, 16  ;;  %vm122_vm0 = vmor %vm114_vm10, %vm118_vm11  ;;  %v585_v18 = vpack.c.bf16 %v24_v11, %v24_v11  ;;  %v537_v22 = vld [vmem:[%s1053_s2 + $0x8] sm:$0xff] }
   0xa   :  { %771 = vmatprep.subr.bf16.mxu1 %v138_v12  ;;  %vm124_vm7 = vmor %vm116_vm4, %vm120_vm5 }
   0xb   :  { %vm929_vm12 = vmand %vm109_vm6, %vm124_vm7 }
   0xc   :  { %vm125_vm15 = vmor %vm117_vm8, %vm121_vm9  ;;  %v132_v36 = vsel %vm929_vm12, 1.0, %v862_v0 }
   0xd   :  { %772 = vmatpush3.bf16.msra.mxu1 %v138_v12  ;;  %vm123_vm4 = vmor %vm115_vm13, %vm119_vm14 }
   0xe   :  { %vm129_vm5 = vmand %vm109_vm6, %vm125_vm15 }
   0xf   :  { %vm126_vm2 = vmand %vm109_vm6, %vm122_vm0  ;;  %v133_v38 = vsel %vm129_vm5, 1.0, %v862_v0 }
  0x10   :  { %774 = vmatmul.mubr.msk.bf16.vlgmr.msra.gmra.mxu1 %vm140_vm3, %v139_v7  ;;  %vm127_vm7 = vmand %vm109_vm6, %vm123_vm4  ;;  %v130_v40 = vsel %vm126_vm2, 1.0, %v862_v0  ;;  %vm593_vm2 = vcmask 1041408   ;;  %vm589_vm6 = vcmask 31744  }
  0x11   :  { %v131_v42 = vsel %vm127_vm7, 1.0, %v862_v0  ;;  %v595_v19 = vsel %vm593_vm2, %v585_v18, 0 }
  0x77   :  { %v588_v20 = vpop.permute.xlu0 %587 }
  0xc8   :  { %v91_v24 = vpop.f32.mrf.mxu1 }
  0xc9   :  { %v92_v25 = vadd.f32 %v700_v21, %v91_v24 }
  0xca   :  { %v767_v26 = vpop.f32.mrf.mxu1 }
  0xcb   :  { %v98_v29 = vmax.f32 %v92_v25, 0.0  ;;  %v40_v26 = vld [vmem:[%s1054_s4 + $0x70] sm:$0xff] }
  0xcc   :  { %v94_v28 = vpop.f32.mrf.mxu1 }
  0xcd   :  { %v95_v30 = vadd.f32 %v700_v21, %v94_v28  ;;  %v935_v34 = vmul.f32 0.5, %v98_v29  ;;  %v536_v21 = vld [vmem:[%s1053_s2] sm:$0xff] }
  0xce   :  { %v768_v31 = vpop.f32.mrf.mxu1  ;;  %v539_v23 = vpack.c.bf16 %v537_v22, %v536_v21 }
  0xcf   :  { %v99_v32 = vmax.f32 %v95_v30, 0.0  ;;  %v648_v30 = vpack.c.bf16 %v41_v27, %v40_v26 }
  0xd0   :  { %v775_v33 = vpop.f32.mrf.mxu1 }
  0xd1   :  { %v937_v35 = vmul.f32 0.5, %v99_v32  ;;  %v190_v43 = vadd.f32 %v775_v33, %v132_v36  ;;  %v38_v32 = vld [vmem:[%s1054_s4 + $0x60] sm:$0xff]  ;;  %v39_v33 = vld [vmem:[%s1054_s4 + $0x68] sm:$0xff]  ;;  %v37_v36 = vld [vmem:[%s1054_s4 + $0x58] sm:$0xff] }
  0xd2   :  { %v181_v37 = vpop.f32.mrf.mxu1 }
  0xd3   :  { %v540_v39 = vpack.c.bf16 %v937_v35, %v935_v34  ;;  %v182_v46 = vadd.f32 %v181_v37, %v130_v40  ;;  %v647_v34 = vpack.c.bf16 %v39_v33, %v38_v32  ;;  %v36_v35 = vld [vmem:[%s1054_s4 + $0x50] sm:$0xff] }
  0xd4   :  { %v776_v41 = vpop.f32.mrf.mxu1  ;;  %v646_v37 = vpack.c.bf16 %v37_v36, %v36_v35 }
  0xd5   :  { %v193_v44 = vadd.f32 %v776_v41, %v133_v38  ;;  %v34_v38 = vld [vmem:[%s1054_s4 + $0x40] sm:$0xff]  ;;  %v32_v41 = vld [vmem:[%s1054_s4 + $0x30] sm:$0xff] }
  0xd6   :  { %v184_v45 = vpop.f32.mrf.mxu1 }
  0xd7   :  { %v197_v47 = vpack.c.bf16 %v193_v44, %v190_v43  ;;  %v185_v48 = vadd.f32 %v184_v45, %v131_v42  ;;  %v33_v42 = vld [vmem:[%s1054_s4 + $0x38] sm:$0xff]  ;;  %v30_v44 = vld [vmem:[%s1054_s4 + $0x20] sm:$0xff]  ;;  %v31_v45 = vld [vmem:[%s1054_s4 + $0x28] sm:$0xff] }
  0xd8   :  { %v644_v43 = vpack.c.bf16 %v33_v42, %v32_v41 }
  0xd9   :  { %v196_v49 = vpack.c.bf16 %v185_v48, %v182_v46  ;;  %777 = vmatprep.subr.bf16.mxu1 %v197_v47  ;;  %v643_v46 = vpack.c.bf16 %v31_v45, %v30_v44 }
  0xda   :  { %778 = vmatpush3.bf16.msra.mxu1 %v197_v47 }
  0xdb   :  { %779 = vmatprep.subr.bf16.mxu1 %v196_v49  ;;  %781 = vmatprep.mubr.msk.bf16.mxu1 %vm140_vm3, %v196_v49 }
  0xde   :  { %780 = vmatpush3.bf16.msra.mxu1 %v196_v49 }
  0xe1   :  { %782 = vmatmul.mubr.msk.bf16.vlgmr.msra.gmra.mxu1 %vm140_vm3, %v197_v47 }
 0x1a1   :  { %v783_v50 = vpop.f32.mrf.mxu1 }
 0x1a3   :  { %v238_v51 = vpop.f32.mrf.mxu1 }
 0x1a5   :  { %v784_v52 = vpop.f32.mrf.mxu1 }
 0x1a6   :  { %v254_v53 = vpack.c.bf16 %v784_v52, %v783_v50  ;;  %v28_v50 = vld [vmem:[%s1054_s4 + $0x10] sm:$0xff] }
 0x1a7   :  { %v241_v54 = vpop.f32.mrf.mxu1 }
 0x1a8   :  { %v253_v55 = vpack.c.bf16 %v241_v54, %v238_v51  ;;  %785 = vmatprep.subr.bf16.mxu1 %v254_v53  ;;  %v29_v51 = vld [vmem:[%s1054_s4 + $0x18] sm:$0xff]  ;;  %v26_v54 = vld [vmem:[%s1054_s4] sm:$0xff] }
 0x1a9   :  { %786 = vmatpush3.bf16.msra.mxu1 %v254_v53 }
 0x1aa   :  { %787 = vmatprep.subr.bf16.mxu1 %v253_v55  ;;  %789 = vmatprep.mubr.msk.bf16.mxu1 %vm140_vm3, %v253_v55 }
 0x1ad   :  { %788 = vmatpush3.bf16.msra.mxu1 %v253_v55  ;;  %v27_v55 = vld [vmem:[%s1054_s4 + $0x8] sm:$0xff] }
 0x1b0   :  { %790 = vmatmul.mubr.msk.bf16.vlgmr.msra.gmra.mxu1 %vm140_vm3, %v254_v53  ;;  %v642_v53 = vpack.c.bf16 %v29_v51, %v28_v50 }
 0x270   :  { %v791_v56 = vpop.f32.mrf.mxu1 }
 0x272   :  { %v295_v57 = vpop.f32.mrf.mxu1 }
 0x274   :  { %v792_v58 = vpop.f32.mrf.mxu1 }
 0x275   :  { %v311_v59 = vpack.c.bf16 %v792_v58, %v791_v56  ;;  %v641_v56 = vpack.c.bf16 %v27_v55, %v26_v54 }
 0x276   :  { %v298_v60 = vpop.f32.mrf.mxu1 }
 0x277   :  { %v310_v61 = vpack.c.bf16 %v298_v60, %v295_v57  ;;  %793 = vmatprep.subr.bf16.mxu0 %v311_v59 }
 0x278   :  { %794 = vmatpush3.bf16.msra.mxu0 %v311_v59 }
 0x279   :  { %795 = vmatprep.subr.bf16.mxu0 %v310_v61  ;;  %797 = vmatprep.mubr.msk.bf16.mxu0 %vm140_vm3, %v310_v61 }
 0x27c   :  { %796 = vmatpush3.bf16.msra.mxu0 %v310_v61 }
 0x27f   :  { %798 = vmatmul.mubr.msk.bf16.vlgmr.msra.gmra.mxu0 %vm140_vm3, %v311_v59 }
 0x33f   :  { %v799_v62 = vpop.f32.mrf.mxu0 }
 0x341   :  { %v352_v63 = vpop.f32.mrf.mxu0 }
 0x343   :  { %v800_v1 = vpop.f32.mrf.mxu0 }
 0x344   :  { %v368_v2 = vpack.c.bf16 %v800_v1, %v799_v62 }
 0x345   :  { %v355_v3 = vpop.f32.mrf.mxu0 }
 0x346   :  { %v367_v4 = vpack.c.bf16 %v355_v3, %v352_v63  ;;  %801 = vmatprep.subr.bf16.mxu1 %v368_v2 }
 0x347   :  { %802 = vmatpush3.bf16.msra.mxu1 %v368_v2 }
 0x348   :  { %803 = vmatprep.subr.bf16.mxu1 %v367_v4  ;;  %805 = vmatprep.mubr.msk.bf16.mxu1 %vm140_vm3, %v367_v4 }
 0x34b   :  { %804 = vmatpush3.bf16.msra.mxu1 %v367_v4 }
 0x34e   :  { %806 = vmatmul.mubr.msk.bf16.vlgmr.msra.gmra.mxu1 %vm140_vm3, %v368_v2 }
 0x40e   :  { %v807_v5 = vpop.f32.mrf.mxu1 }
 0x410   :  { %v409_v6 = vpop.f32.mrf.mxu1 }
 0x412   :  { %v808_v7 = vpop.f32.mrf.mxu1 }
 0x413   :  { %v425_v8 = vpack.c.bf16 %v808_v7, %v807_v5 }
 0x414   :  { %v412_v9 = vpop.f32.mrf.mxu1 }
 0x415   :  { %v424_v10 = vpack.c.bf16 %v412_v9, %v409_v6  ;;  %809 = vmatprep.subr.bf16.mxu0 %v425_v8 }
 0x416   :  { %810 = vmatpush3.bf16.msra.mxu0 %v425_v8 }
 0x417   :  { %811 = vmatprep.subr.bf16.mxu0 %v424_v10  ;;  %813 = vmatprep.mubr.msk.bf16.mxu0 %vm140_vm3, %v424_v10 }
 0x41a   :  { %812 = vmatpush3.bf16.msra.mxu0 %v424_v10 }
 0x41b   :  { %825 = vmatprep.subr.bf16.mxu0 %v862_v0 }
 0x41d   :  { %814 = vmatmul.mubr.msk.bf16.vlgmr.msra.gmra.mxu0 %vm140_vm3, %v425_v8 }
 0x41e   :  { %826 = vmatpush3.bf16.msra.mxu0 %v540_v39  ;;  %829 = vmatprep.mubr.msk.bf16.mxu0 %vm863_vm1, %v862_v0  ;;  %v35_v39 = vld [vmem:[%s1054_s4 + $0x48] sm:$0xff] }
 0x41f   :  { %827 = vmatprep.subr.bf16.mxu0 %v862_v0  ;;  %v645_v40 = vpack.c.bf16 %v35_v39, %v34_v38 }
 0x422   :  { %828 = vmatpush3.bf16.msra.mxu0 %v539_v23 }
 0x423   :  { %839 = vmatprep.subr.bf16.mxu0 %v862_v0 }
 0x4dd   :  { %v815_v12 = vpop.f32.mrf.mxu0 }
 0x4df   :  { %v466_v13 = vpop.f32.mrf.mxu0 }
 0x4e1   :  { %v816_v14 = vpop.f32.mrf.mxu0 }
 0x4e2   :  { %v482_v15 = vpack.c.bf16 %v816_v14, %v815_v12 }
 0x4e3   :  { %v469_v16 = vpop.f32.mrf.mxu0 }
 0x4e4   :  { %v481_v17 = vpack.c.bf16 %v469_v16, %v466_v13  ;;  %817 = vmatprep.subr.bf16.mxu1 %v482_v15 }
 0x4e5   :  { %818 = vmatpush3.bf16.msra.mxu1 %v482_v15 }
 0x4e6   :  { %819 = vmatprep.subr.bf16.mxu1 %v481_v17  ;;  %821 = vmatprep.mubr.msk.bf16.mxu1 %vm140_vm3, %v481_v17 }
 0x4e9   :  { %820 = vmatpush3.bf16.msra.mxu1 %v481_v17 }
 0x4ea   :  { %833 = vmatprep.subr.bf16.mxu1 %v862_v0 }
 0x4ec   :  { %822 = vmatmul.mubr.msk.bf16.vlgmr.msra.gmra.mxu1 %vm140_vm3, %v482_v15 }
 0x4ed   :  { %835 = vmatprep.mubr.msk.bf16.mxu1 %vm863_vm1, %v862_v0  ;;  %834 = vmatpush3.bf16.msra.mxu1 %v595_v19 }
 0x4f4   :  { %836 = vmatmul.mubr.msk.bf16.vlgmr.msra.gmra.mxu1 %vm589_vm6, %v588_v20 }
 0x5ac   :  { %v823_v24 = vpop.f32.mrf.mxu1 }
 0x5ae   :  { %v523_v25 = vpop.f32.mrf.mxu1 }
 0x5b0   :  { %v824_v28 = vpop.f32.mrf.mxu1 }
 0x5b2   :  { %v526_v29 = vpop.f32.mrf.mxu1 }
 0x5b3   :  { %v538_v31 = vpack.c.bf16 %v526_v29, %v523_v25 }
 0x5b4   :  { %v631_v47 = vpop.f32.mrf.mxu1 }
 0x5b5   :  { %830 = vmatmul.mubr.msk.bf16.vlgmr.msra.gmra.mxu0 %vm140_vm3, %v538_v31 }
 0x5b6   :  { %840 = vmatpush3.bf16.msra.mxu0 %v648_v30  ;;  %855 = vmatprep.mubr.msk.bf16.mxu0 %vm863_vm1, %v862_v0  ;;  %v837_v48 = vpop.f32.mrf.mxu1  ;;  %vm1059_vm1 = vcmask 64512  }
 0x5b7   :  { %841 = vmatprep.subr.bf16.mxu0 %v862_v0  ;;  %vm1060_vm3 = vmmov %vm1059_vm1 }
 0x5b8   :  { %v634_v49 = vpop.f32.mrf.mxu1 }
 0x5ba   :  { %842 = vmatpush3.bf16.msra.mxu0 %v647_v34  ;;  %v838_v52 = vpop.f32.mrf.mxu1 }
 0x5bb   :  { %843 = vmatprep.subr.bf16.mxu0 %v862_v0 }
 0x5be   :  { %844 = vmatpush3.bf16.msra.mxu0 %v646_v37 }
 0x5bf   :  { %845 = vmatprep.subr.bf16.mxu0 %v862_v0 }
 0x5c2   :  { %846 = vmatpush3.bf16.msra.mxu0 %v645_v40 }
 0x5c3   :  { %847 = vmatprep.subr.bf16.mxu0 %v862_v0 }
 0x5c6   :  { %848 = vmatpush3.bf16.msra.mxu0 %v644_v43 }
 0x5c7   :  { %849 = vmatprep.subr.bf16.mxu0 %v862_v0 }
 0x5ca   :  { %850 = vmatpush3.bf16.msra.mxu0 %v643_v46 }
 0x5cb   :  { %851 = vmatprep.subr.bf16.mxu0 %v862_v0 }
 0x5ce   :  { %852 = vmatpush3.bf16.msra.mxu0 %v642_v53 }
 0x5cf   :  { %853 = vmatprep.subr.bf16.mxu0 %v862_v0  ;;  %v718_v0 = vld [vmem:[%s1054_s4 + $0x80] ss:$0 sm:$0xff] }
 0x5d2   :  { %854 = vmatpush3.bf16.msra.mxu0 %v641_v56 }
 0x675   :  { %v578_v57 = vpop.f32.mrf.mxu0 }
 0x676   :  { %v638_v60 = vmul.f32 %v631_v47, %v578_v57 }
 0x677   :  { %v831_v58 = vpop.f32.mrf.mxu0 }
 0x679   :  { %v581_v59 = vpop.f32.mrf.mxu0 }
 0x67a   :  { %v639_v61 = vmul.f32 %v634_v49, %v581_v59 }
 0x67b   :  { %v832_v62 = vpop.f32.mrf.mxu0 }
 0x67c   :  { %v640_v63 = vpack.c.bf16 %v639_v61, %v638_v60 }
 0x67e   :  { %856 = vmatmul.mubr.bf16.vlgmr.msra.gmra.mxu0 %v640_v63 }
 0x73e   :  { %v687_v1 = vpop.f32.mrf.mxu0 }
 0x73f   :  { %v688_v2 = vadd.f32 %v718_v0, %v687_v1 }
 0x740   :  { %v857_v3 = vpop.f32.mrf.mxu0 }
 0x741   :  { %694 = vst.msk [vmem:[%s1055_s5] sm:$0xff] %vm1059_vm1, %v688_v2 }
 0x742   :  { %v690_v4 = vpop.f32.mrf.mxu0 }
 0x743   :  { %v691_v5 = vadd.f32 %v718_v0, %v690_v4 }
 0x744   :  { %v858_v6 = vpop.f32.mrf.mxu0 }
 0x745   :  { %695 = vst.msk [vmem:[%s1055_s5 + $0x8] sm:$0xff] %vm1060_vm3, %v691_v5 }

</bundles_post_ra>
